<compile_context>
chip_gen: v7x
topology: tpu7x:2x2x1
jax: 0.10.0
libtpu: 0.0.40
codegen_flags: <defaults>
</compile_context>

<pallas_src>
import functools

import jax
import jax.numpy as jnp
from jax.experimental import pallas as pl
from jax.experimental.pallas import tpu as pltpu

_LANE = 128
_SUBLANE = 8


def _round_up(n, m):
    return ((n + m - 1) // m) * m


def _policy_kernel(x_ref, w1_ref, b1_ref, w2_ref, b2_ref, mean_ref):
    # fc1: MXU matmul with f32 accumulation, bias + relu in f32 on the VPU.
    h = jnp.dot(x_ref[...], w1_ref[...], preferred_element_type=jnp.float32)
    h = jnp.maximum(h + b1_ref[...], 0.0)
    # fc2_mean: output columns are zero-padded to 128 so the store is a full,
    # unmasked lane-dense vst.
    m = jnp.dot(h.astype(w2_ref.dtype), w2_ref[...],
                preferred_element_type=jnp.float32)
    mean_ref[...] = (m + b2_ref[...]).astype(mean_ref.dtype)


@functools.partial(jax.jit, static_argnames=("block_batch", "compute_dtype"))
def policy_forward(x, w1, b1, w2, b2, variance, *,
                   block_batch=512, compute_dtype=jnp.float32):
    """Policy forward pass.

    Args:
      x:        (B, S)  float32 input states.
      w1:       (H, S)  fc1 weight (PyTorch (out, in) layout).
      b1:       (H,)    fc1 bias.
      w2:       (A, H)  fc2_mean weight (PyTorch (out, in) layout).
      b2:       (A,)    fc2_mean bias.
      variance: (1,)    float32 variance (sigma^2) passed to forward().
      block_batch:  batch tile size (rounded to a multiple of 8, capped at B).
      compute_dtype: dtype for x / weights inside the kernel.  Use
        jnp.bfloat16 on v6e/v7x to halve input DMA bytes; accumulation stays
        f32 on the MXU and bias/relu stay f32 on the VPU.

    Returns:
      (mean, std): both (B, A) float32 — the parameters of Normal(mean, std).
    """
    B, S = x.shape
    H = w1.shape[0]
    A = w2.shape[0]

    # ---- layout plumbing in the wrapper (not in the kernel) -----------------
    A_pad = _round_up(A, _LANE)                    # lane-dense output columns
    TB = _round_up(min(block_batch, _round_up(B, _SUBLANE)), _SUBLANE)
    B_pad = _round_up(B, TB)
    grid_b = pl.cdiv(B_pad, TB)

    x_p = x if B_pad == B else jnp.pad(x, ((0, B_pad - B), (0, 0)))
    x_p = x_p.astype(compute_dtype)

    w1_t = w1.T.astype(compute_dtype)                                  # (S, H)
    w2_t = jnp.pad(w2.T, ((0, 0), (0, A_pad - A))).astype(compute_dtype)  # (H, A_pad)
    b1_r = b1.reshape(1, H).astype(jnp.float32)                        # (1, H)
    b2_r = jnp.pad(b2.reshape(1, A),
                   ((0, 0), (0, A_pad - A))).astype(jnp.float32)       # (1, A_pad)

    mean_p = pl.pallas_call(
        _policy_kernel,
        out_shape=jax.ShapeDtypeStruct((B_pad, A_pad), jnp.float32),
        grid=(grid_b,),
        in_specs=[
            pl.BlockSpec((TB, S), lambda i: (i, 0)),       # x: streamed over batch
            pl.BlockSpec((S, H), lambda i: (0, 0)),        # w1_t: resident
            pl.BlockSpec((1, H), lambda i: (0, 0)),        # b1:   resident
            pl.BlockSpec((H, A_pad), lambda i: (0, 0)),    # w2_t: resident
            pl.BlockSpec((1, A_pad), lambda i: (0, 0)),    # b2:   resident
        ],
        out_specs=pl.BlockSpec((TB, A_pad), lambda i: (i, 0)),
        compiler_params=pltpu.CompilerParams(
            dimension_semantics=("parallel",),             # megacore on v7x
            vmem_limit_bytes=32 * 1024 * 1024,             # explicit for v5e's 16 MiB default
        ),
    )(x_p, w1_t, b1_r, w2_t, b2_r)

    mean = mean_p[:B, :A]
    # std = sqrt(variance): constant broadcast, done outside the kernel.
    std = jnp.broadcast_to(jnp.sqrt(variance.astype(jnp.float32)), mean.shape)
    return mean, std


def init_policy_params(key, state_space, action_space, hidden=64):
    """Mirrors Policy.init_weights(): weights ~ Normal(0, 1), biases = 0,
    sigma parameter = 10.0 (not used in forward)."""
    k1, k2 = jax.random.split(key)
    w1 = jax.random.normal(k1, (hidden, state_space), dtype=jnp.float32)   # (out, in)
    b1 = jnp.zeros((hidden,), dtype=jnp.float32)
    w2 = jax.random.normal(k2, (action_space, hidden), dtype=jnp.float32)  # (out, in)
    b2 = jnp.zeros((action_space,), dtype=jnp.float32)
    sigma = jnp.array([10.0], dtype=jnp.float32)  # nn.Parameter; unused in forward
    return dict(w1=w1, b1=b1, w2=w2, b2=b2, sigma=sigma)


if __name__ == "__main__":
    key = jax.random.PRNGKey(0)
    state_space = 8
    action_space = 4
    hidden = 64
    batch = 8

    params = init_policy_params(key, state_space, action_space, hidden)

    kx, _ = jax.random.split(jax.random.PRNGKey(0), 2)
    x = jax.random.normal(kx, (batch, state_space), dtype=jnp.float32)
    variance = jnp.array([4.0], dtype=jnp.float32)  # sigma^2 passed to forward

    mean, std = policy_forward(
        x,
        params["w1"], params["b1"],
        params["w2"], params["b2"],
        variance,
    )
    jax.block_until_ready((mean, std))

    # Pure-JAX reference of the same math.
    h_ref = jnp.maximum(x @ params["w1"].T + params["b1"][None, :], 0.0)
    mean_ref = h_ref @ params["w2"].T + params["b2"][None, :]
    std_ref = jnp.broadcast_to(jnp.sqrt(variance), mean_ref.shape)
    assert mean.shape == (batch, action_space)
    assert std.shape == (batch, action_space)
    assert jnp.allclose(mean, mean_ref, atol=1e-4, rtol=1e-4)
    assert jnp.allclose(std, std_ref, atol=1e-6)

    # TODO(synk): torch.distributions.Normal object itself has no Pallas
    # equivalent; the distribution is returned as its (mean, std) tensors.

    print("KERNEL_OK")
</pallas_src>

<mosaic_0001>
module attributes {stable_mosaic.version = 11 : i64} {
  func.func @_policy_kernel(%arg0: i32, %arg1: memref<8x8xf32, #tpu.memory_space<vmem>>, %arg2: memref<8x64xf32, #tpu.memory_space<vmem>>, %arg3: memref<1x64xf32, #tpu.memory_space<vmem>>, %arg4: memref<64x128xf32, #tpu.memory_space<vmem>>, %arg5: memref<1x128xf32, #tpu.memory_space<vmem>>, %arg6: memref<8x128xf32, #tpu.memory_space<vmem>>) attributes {dimension_semantics = [#tpu.dimension_semantics<parallel>], iteration_bounds = array<i64: 1>, scalar_prefetch = 0 : i64, scratch_operands = 0 : i64, tpu.core_type = #tpu.core_type<tc>, window_params = [{transform_indices = @transform_0, window_bounds = array<i64: 8, 8>}, {pipeline_mode = #tpu.pipeline_mode<synchronous>, transform_indices = @transform_1, window_bounds = array<i64: 8, 64>}, {pipeline_mode = #tpu.pipeline_mode<synchronous>, transform_indices = @transform_2, window_bounds = array<i64: 1, 64>}, {pipeline_mode = #tpu.pipeline_mode<synchronous>, transform_indices = @transform_3, window_bounds = array<i64: 64, 128>}, {pipeline_mode = #tpu.pipeline_mode<synchronous>, transform_indices = @transform_4, window_bounds = array<i64: 1, 128>}, {transform_indices = @transform_5, window_bounds = array<i64: 8, 128>}]} {
    %c0 = arith.constant 0 : index
    %c0_0 = arith.constant 0 : index
    %0 = vector.load %arg1[%c0, %c0_0] : memref<8x8xf32, #tpu.memory_space<vmem>>, vector<8x8xf32>
    %c0_1 = arith.constant 0 : index
    %c0_2 = arith.constant 0 : index
    %1 = vector.load %arg2[%c0_1, %c0_2] : memref<8x64xf32, #tpu.memory_space<vmem>>, vector<8x64xf32>
    %cst = arith.constant dense<0.000000e+00> : vector<8x64xf32>
    %2 = tpu.matmul %0, %1, %cst {dimension_numbers = #tpu.dot_dimension_numbers<[1], [0], [0], [1], [0, 0, 1, 1], [], []>} : vector<8x8xf32>, vector<8x64xf32>, vector<8x64xf32> -> vector<8x64xf32>
    %c0_3 = arith.constant 0 : index
    %c0_4 = arith.constant 0 : index
    %3 = vector.load %arg3[%c0_3, %c0_4] : memref<1x64xf32, #tpu.memory_space<vmem>>, vector<1x64xf32>
    %4 = vector.broadcast %3 : vector<1x64xf32> to vector<8x64xf32>
    %5 = arith.addf %2, %4 : vector<8x64xf32>
    %cst_5 = arith.constant 0.000000e+00 : f32
    %6 = vector.broadcast %cst_5 : f32 to vector<8x64xf32>
    %7 = arith.maximumf %5, %6 : vector<8x64xf32>
    %c0_6 = arith.constant 0 : index
    %c0_7 = arith.constant 0 : index
    %8 = vector.load %arg4[%c0_6, %c0_7] : memref<64x128xf32, #tpu.memory_space<vmem>>, vector<64x128xf32>
    %cst_8 = arith.constant dense<0.000000e+00> : vector<8x128xf32>
    %9 = tpu.matmul %7, %8, %cst_8 {dimension_numbers = #tpu.dot_dimension_numbers<[1], [0], [0], [1], [0, 0, 1, 1], [], []>} : vector<8x64xf32>, vector<64x128xf32>, vector<8x128xf32> -> vector<8x128xf32>
    %c0_9 = arith.constant 0 : index
    %c0_10 = arith.constant 0 : index
    %10 = vector.load %arg5[%c0_9, %c0_10] : memref<1x128xf32, #tpu.memory_space<vmem>>, vector<1x128xf32>
    %11 = vector.broadcast %10 : vector<1x128xf32> to vector<8x128xf32>
    %12 = arith.addf %9, %11 : vector<8x128xf32>
    %c0_11 = arith.constant 0 : index
    %c0_12 = arith.constant 0 : index
    %13 = vector.load %arg6[%c0_11, %c0_12] : memref<8x128xf32, #tpu.memory_space<vmem>>, vector<8x128xf32>
    tpu.vector_store %arg6[%c0_11, %c0_12], %12 {strides = array<i32>} : memref<8x128xf32, #tpu.memory_space<vmem>>, vector<8x128xf32>,
    return
  }
  func.func @transform_0(%arg0: i32) -> (i32, i32) {
    %c0_i32 = arith.constant 0 : i32
    %c0_i32_0 = arith.constant 0 : i32
    return %arg0, %c0_i32 : i32, i32
  }
  func.func @transform_1(%arg0: i32) -> (i32, i32) {
    %c0_i32 = arith.constant 0 : i32
    %c0_i32_0 = arith.constant 0 : i32
    %c0_i32_1 = arith.constant 0 : i32
    return %c0_i32, %c0_i32_0 : i32, i32
  }
  func.func @transform_2(%arg0: i32) -> (i32, i32) {
    %c0_i32 = arith.constant 0 : i32
    %c0_i32_0 = arith.constant 0 : i32
    %c0_i32_1 = arith.constant 0 : i32
    return %c0_i32, %c0_i32_0 : i32, i32
  }
  func.func @transform_3(%arg0: i32) -> (i32, i32) {
    %c0_i32 = arith.constant 0 : i32
    %c0_i32_0 = arith.constant 0 : i32
    %c0_i32_1 = arith.constant 0 : i32
    return %c0_i32, %c0_i32_0 : i32, i32
  }
  func.func @transform_4(%arg0: i32) -> (i32, i32) {
    %c0_i32 = arith.constant 0 : i32
    %c0_i32_0 = arith.constant 0 : i32
    %c0_i32_1 = arith.constant 0 : i32
    return %c0_i32, %c0_i32_0 : i32, i32
  }
  func.func @transform_5(%arg0: i32) -> (i32, i32) {
    %c0_i32 = arith.constant 0 : i32
    %c0_i32_0 = arith.constant 0 : i32
    return %arg0, %c0_i32 : i32, i32
  }
}

</mosaic_0001>

<bundles_post_ra>
// kernel: policy_forward.1
= control target key start
LH: loop header
LB: loop body
LE: loop exit
PB: predicated region body
PF: predicated region fallthrough
CT: control target
= control target key end

     0   :  { %vm29_vm0 = vcmask 64512   ;;  %v252_v0 = vmov 0.0   ;;  %vm253_vm1 = vmmov 0   ;;  %v254_v4 = vmov 0.0|0.0   ;;  %s324_s1 = inlined_call_operand.vmem [shape: f32[8,64], index: 1, kind: input, shape index: {}]   ;;  %s325_s0 = inlined_call_operand.vmem [shape: f32[8,8], index: 0, kind: input, shape index: {}]   ;;  %s326_s3 = inlined_call_operand.vmem [shape: f32[64,128], index: 3, kind: input, shape index: {}]   ;;  %s327_s2 = inlined_call_operand.vmem [shape: f32[1,64], index: 2, kind: input, shape index: {}]   ;;  %s328_s4 = inlined_call_operand.vmem [shape: f32[1,128], index: 4, kind: input, shape index: {}]   ;;  %s329_s5 = inlined_call_operand.vmem [shape: f32[8,128], index: 5, kind: output, shape index: {}]  }
   0x1   :  { %213 = vmatprep.subr.mxu0 %v252_v0  ;;  %v21_v1 = vld [vmem:[%s324_s1] sm:$0xff]  ;;  %215 = vmatprep.mubr.msk.f32.mxu0 %vm253_vm1, %v252_v0  ;;  %v105_v5 = vld [vmem:[%s326_s3 + $0x8] sm:$0xff]  ;;  %v106_v6 = vld [vmem:[%s326_s3 + $0x10] sm:$0xff]  ;;  %vm119_vm2 = vcmask 523264  }
   0x2   :  { %v20_v2 = vld [vmem:[%s325_s0] sm:$0xff]  ;;  %214 = vmatpush3.msra.mxu0 %v21_v1  ;;  %237 = vmatprep.subr.bf16.mxu1 %v254_v4  ;;  %v107_v7 = vld [vmem:[%s326_s3 + $0x18] sm:$0xff]  ;;  %v109_v11 = vld [vmem:[%s326_s3 + $0x28] sm:$0xff] }
   0x3   :  { %v104_v3 = vld [vmem:[%s326_s3] sm:$0xff]  ;;  %216 = vmatmul.mubr.msk.f32.vlgmr.msra.gmra.mrb[0].mxu0 %vm29_vm0, %v20_v2  ;;  %234 = vmatprep.mubr.msk.f32.mxu1 %vm253_vm1, %v252_v0  ;;  %v241_v9 = vpack.c.bf16 %v107_v7, %v106_v6  ;;  %v110_v13 = vld [vmem:[%s326_s3 + $0x30] sm:$0xff]  ;;  %v111_v14 = vld [vmem:[%s326_s3 + $0x38] sm:$0xff] }
   0x4   :  { %v238_v8 = vpack.c.bf16 %v105_v5, %v104_v3  ;;  %v108_v10 = vld [vmem:[%s326_s3 + $0x20] sm:$0xff]  ;;  %v247_v15 = vpack.c.bf16 %v111_v14, %v110_v13 }
   0x5   :  { %v244_v12 = vpack.c.bf16 %v109_v11, %v108_v10  ;;  %v198_v16 = vld [vmem:[%s327_s2] ss:$0 sm:$0xff] }
   0x6   :  { %239 = vmatpush3.bf16.msra.mxu1 %v238_v8  ;;  %v200_v21 = vld [vmem:[%s328_s4] ss:$0 sm:$0xff] }
   0x7   :  { %240 = vmatprep.subr.bf16.mxu1 %v254_v4 }
   0xa   :  { %242 = vmatpush3.bf16.msra.mxu1 %v241_v9 }
   0xb   :  { %243 = vmatprep.subr.bf16.mxu1 %v254_v4 }
   0xe   :  { %245 = vmatpush3.bf16.msra.mxu1 %v244_v12 }
   0xf   :  { %246 = vmatprep.subr.bf16.mxu1 %v254_v4 }
  0x12   :  { %248 = vmatpush3.bf16.msra.mxu1 %v247_v15 }
  0xd6   :  { %v99_v17 = vpop.f32.mrb[0].mxu0 }
  0xd7   :  { %v100_v18 = vadd.f32 %v198_v16, %v99_v17  ;;  %v217_v19 = vpop.f32.mrb[1].mxu0 }
  0xd9   :  { %v103_v20 = vmax.f32 %v100_v18, 0.0 }
  0xdb   :  { %235 = vmatmul.mubr.msk.f32.vlgmr.msra.gmra.mrb[0].mxu1 %vm119_vm2, %v103_v20 }
 0x1ae   :  { %v189_v22 = vpop.f32.mrb[0].mxu1 }
 0x1af   :  { %v190_v23 = vadd.f32 %v200_v21, %v189_v22  ;;  %v236_v24 = vpop.f32.mrb[1].mxu1 }
 0x1b1   :  { %193 = vst [vmem:[%s329_s5] sm:$0xff] %v190_v23 }

</bundles_post_ra>
